<compile_context>
chip_gen: v6e
topology: v6e:2x2x1
jax: 0.10.0
libtpu: 0.0.40
codegen_flags: <defaults>
</compile_context>

<pallas_src>
import jax
import jax.numpy as jnp
from jax import lax
from jax.experimental import pallas as pl
from jax.experimental.pallas import tpu as pltpu


# ----------------------------------------------------------------------------
# Pallas kernel: one (batch, query-tile) step.
#   pxq_ref : (1, tq, cx)    row-major x-patches for this query tile
#   pxt_ref : (1, cx, L)     transposed x-patches (L on the lane axis)
#   wq_ref  : (cx, 48)  bq_ref : (1, 48)      DC-fused query projection
#   wkt_ref : (48, cx)  bkt_ref: (48, 1)      DC-fused key projection (transposed)
#   wvt_ref : (cx+1, cx) bvt_ref: (cx+1, 1)   value projection (transposed) with an
#                                             appended all-ones row (softmax denom)
#   o_ref   : (1, cx, tq)    output tile in (channels, positions) layout
# ----------------------------------------------------------------------------
def _dgm_attention_kernel(pxq_ref, pxt_ref,
                          wq_ref, bq_ref,
                          wkt_ref, bkt_ref,
                          wvt_ref, bvt_ref,
                          o_ref):
    cx = o_ref.shape[1]

    pxq = pxq_ref[0]                                   # (tq, cx)
    pxt = pxt_ref[0]                                   # (cx, L)

    # Projections (f32; tiny contraction dim, cheap).
    q = jnp.dot(pxq, wq_ref[...],
                preferred_element_type=jnp.float32) + bq_ref[...]          # (tq, 48)
    k_t = jnp.dot(wkt_ref[...], pxt,
                  preferred_element_type=jnp.float32) + bkt_ref[...]       # (48, L)
    v_t = jnp.dot(wvt_ref[...], pxt,
                  preferred_element_type=jnp.float32) + bvt_ref[...]       # (cx+1, L)

    # Scores s[l, m] = q[l] . k[m]  (bf16 operands, f32 accumulation on MXU).
    s = lax.dot_general(q.astype(jnp.bfloat16), k_t.astype(jnp.bfloat16),
                        (((1,), (0,)), ((), ())),
                        preferred_element_type=jnp.float32)                # (tq, L)

    # Softmax over keys with deferred normalization.
    mx = jnp.max(s, axis=-1, keepdims=True)
    p = jnp.exp(s - mx)                                                    # (tq, L)

    # o_aug[f, l] = sum_m v_aug[f, m] * p[l, m]; last row of v_aug is all ones,
    # so the last row of o_aug holds the per-query softmax denominators.
    o_aug = lax.dot_general(v_t.astype(jnp.bfloat16), p.astype(jnp.bfloat16),
                            (((1,), (1,)), ((), ())),
                            preferred_element_type=jnp.float32)            # (cx+1, tq)

    denom = o_aug[cx:cx + 1, :]                                            # (1, tq)
    o_ref[0] = o_aug[:cx, :] * pl.reciprocal(denom, approx=True)


# ----------------------------------------------------------------------------
# Host-side glue (patch extraction / weight preprocessing).
# ----------------------------------------------------------------------------
def _extract_patches(x):
    """(b, c, h, w) -> (b, L, c*4); feature order (c, kh, kw), L = (h//2)*(w//2)."""
    b, c, h, w = x.shape
    h2, w2 = h // 2, w // 2
    p = x.reshape(b, c, h2, 2, w2, 2)
    p = jnp.transpose(p, (0, 2, 4, 1, 3, 5))           # (b, h2, w2, c, 2, 2)
    return p.reshape(b, h2 * w2, c * 4)


def _extract_patches_t(x):
    """(b, c, h, w) -> (b, c*4, L): same patches, L on the last (lane) axis."""
    b, c, h, w = x.shape
    h2, w2 = h // 2, w // 2
    p = x.reshape(b, c, h2, 2, w2, 2)
    p = jnp.transpose(p, (0, 1, 3, 5, 2, 4))           # (b, c, 2, 2, h2, w2)
    return p.reshape(b, c * 4, h2 * w2)


def _flatten_conv_weight(w):
    """PyTorch Conv2d weight (out_c, in_c, 2, 2) -> (in_c*4, out_c)."""
    out_c = w.shape[0]
    return jnp.transpose(w.reshape(out_c, -1), (1, 0))


def _pick_query_tile(L):
    for t in (512, 256, 128):
        if L % t == 0:
            return t
    return L


def dgm_forward(x, params):
    """x: (b, c, h, w) float32. Returns (b, c, h, w)."""
    b, c, h, w = x.shape
    L = (h // 2) * (w // 2)
    cq = 12 * 2 * 2            # 48
    cx = c * 2 * 2             # 4c
    tq = _pick_query_tile(L)
    nq = L // tq

    # --- DC module folded into the q/k projection weights ---------------------
    # TODO(synk): DC's exact definition is not in the provided source; it is
    # modeled as a deterministic 1x1 conv (c -> 12 direction channels).  A 1x1
    # conv commutes with 2x2 patch extraction, so it is folded into wq/wk here
    # and the kernel only ever reads the x-patches (no dir_map round trip).
    eye4 = jnp.eye(4, dtype=x.dtype)
    A = jnp.einsum('oc,pq->cpoq', params['dc_w'], eye4).reshape(cx, cq)   # (cx, 48)
    dcb_patch = jnp.repeat(params['dc_b'], 4)                             # (48,)

    wq_flat = _flatten_conv_weight(params['q_w'])      # (48, 48)
    wk_flat = _flatten_conv_weight(params['k_w'])      # (48, 48)
    wv_flat = _flatten_conv_weight(params['v_w'])      # (cx, cx)

    wq = A @ wq_flat                                   # (cx, 48)
    bq = (dcb_patch @ wq_flat + params['q_b'])[None, :]        # (1, 48)
    wkt = (A @ wk_flat).T                              # (48, cx)
    bkt = (dcb_patch @ wk_flat + params['k_b'])[:, None]       # (48, 1)

    # Value projection (transposed) with an appended all-ones output row that
    # yields the softmax denominators from the same matmul.
    wvt = jnp.concatenate([wv_flat.T, jnp.zeros((1, cx), x.dtype)], axis=0)   # (cx+1, cx)
    bvt = jnp.concatenate([params['v_b'], jnp.ones((1,), x.dtype)])[:, None]  # (cx+1, 1)

    pxq = _extract_patches(x)      # (b, L, cx)  -- streamed once as query tiles
    pxt = _extract_patches_t(x)    # (b, cx, L)  -- resident per batch for k/v

    out_t = pl.pallas_call(
        _dgm_attention_kernel,
        out_shape=jax.ShapeDtypeStruct((b, cx, L), jnp.float32),
        grid_spec=pltpu.PrefetchScalarGridSpec(
            num_scalar_prefetch=0,
            grid=(b, nq),
            in_specs=[
                pl.BlockSpec((1, tq, cx), lambda i, j: (i, j, 0)),   # pxq tile
                pl.BlockSpec((1, cx, L), lambda i, j: (i, 0, 0)),    # pxt (per batch)
                pl.BlockSpec((cx, cq), lambda i, j: (0, 0)),         # wq
                pl.BlockSpec((1, cq), lambda i, j: (0, 0)),          # bq
                pl.BlockSpec((cq, cx), lambda i, j: (0, 0)),         # wkt
                pl.BlockSpec((cq, 1), lambda i, j: (0, 0)),          # bkt
                pl.BlockSpec((cx + 1, cx), lambda i, j: (0, 0)),     # wvt
                pl.BlockSpec((cx + 1, 1), lambda i, j: (0, 0)),      # bvt
            ],
            out_specs=pl.BlockSpec((1, cx, tq), lambda i, j: (i, 0, j)),
        ),
        compiler_params=pltpu.CompilerParams(
            dimension_semantics=("parallel", "parallel"),
            vmem_limit_bytes=56 * 1024 * 1024),
    )(pxq, pxt, wq, bq, wkt, bkt, wvt, bvt)            # (b, 4c, L), PyTorch layout

    # PyTorch epilogue: output.view(b, h, w, c).permute(0, 3, 1, 2) + x
    out = out_t.reshape(b, h, w, c)                    # raw C-order reinterpretation
    out = jnp.transpose(out, (0, 3, 1, 2))
    return out + x


# ----------------------------------------------------------------------------
# Pure-JAX reference (mirrors the PyTorch forward; used as a numeric check).
# ----------------------------------------------------------------------------
def dgm_reference(x, params):
    b, c, h, w = x.shape
    dir_map = jnp.einsum('bchw,oc->bohw', x, params['dc_w']) \
        + params['dc_b'][None, :, None, None]
    pq = _extract_patches(dir_map)                                  # (b, L, 48)
    pv = _extract_patches(x)                                        # (b, L, 4c)
    q = pq @ _flatten_conv_weight(params['q_w']) + params['q_b']
    k = pq @ _flatten_conv_weight(params['k_w']) + params['k_b']
    v = pv @ _flatten_conv_weight(params['v_w']) + params['v_b']
    att = jax.nn.softmax(jnp.einsum('bld,bmd->blm', q, k), axis=-1)
    out = jnp.einsum('bmf,blm->bfl', v, att)                        # (b, 4c, L)
    out = out.reshape(b, h, w, c)
    out = jnp.transpose(out, (0, 3, 1, 2))
    return out + x


def init_params(dim, key):
    k = jax.random.split(key, 8)
    cq = 12 * 2 * 2
    cv = dim * 2 * 2
    scale = 0.05
    return {
        'dc_w': scale * jax.random.normal(k[0], (12, dim), jnp.float32),
        'dc_b': scale * jax.random.normal(k[1], (12,), jnp.float32),
        'q_w': scale * jax.random.normal(k[2], (cq, 12, 2, 2), jnp.float32),
        'q_b': scale * jax.random.normal(k[3], (cq,), jnp.float32),
        'k_w': scale * jax.random.normal(k[4], (cq, 12, 2, 2), jnp.float32),
        'k_b': scale * jax.random.normal(k[5], (cq,), jnp.float32),
        'v_w': scale * jax.random.normal(k[6], (cv, dim, 2, 2), jnp.float32),
        'v_b': scale * jax.random.normal(k[7], (cv,), jnp.float32),
    }


if __name__ == "__main__":
    key = jax.random.PRNGKey(0)
    b, c, h, w = 2, 4, 16, 16          # dim=4, input_resolution=(16, 16)
    xkey, pkey = jax.random.split(key)
    x = jax.random.normal(xkey, (b, c, h, w), jnp.float32)
    params = init_params(c, pkey)

    out = jax.jit(dgm_forward)(x, params)
    jax.block_until_ready(out)
    assert out.shape == (b, c, h, w), out.shape

    ref = dgm_reference(x, params)
    max_err = float(jnp.max(jnp.abs(out - ref)))
    assert max_err < 2e-2, f"max abs error vs reference: {max_err}"

    print("KERNEL_OK")
</pallas_src>

<mosaic_0001>
module attributes {stable_mosaic.version = 11 : i64} {
  func.func @_dgm_attention_kernel(%arg0: i32, %arg1: i32, %arg2: memref<1x64x16xf32, #tpu.memory_space<vmem>>, %arg3: memref<1x16x64xf32, #tpu.memory_space<vmem>>, %arg4: memref<16x48xf32, #tpu.memory_space<vmem>>, %arg5: memref<1x48xf32, #tpu.memory_space<vmem>>, %arg6: memref<48x16xf32, #tpu.memory_space<vmem>>, %arg7: memref<48x1xf32, #tpu.memory_space<vmem>>, %arg8: memref<17x16xf32, #tpu.memory_space<vmem>>, %arg9: memref<17x1xf32, #tpu.memory_space<vmem>>, %arg10: memref<1x16x64xf32, #tpu.memory_space<vmem>>) attributes {dimension_semantics = [#tpu.dimension_semantics<parallel>, #tpu.dimension_semantics<parallel>], iteration_bounds = array<i64: 2, 1>, scalar_prefetch = 0 : i64, scratch_operands = 0 : i64, tpu.core_type = #tpu.core_type<tc>, window_params = [{transform_indices = @transform_0, window_bounds = array<i64: 1, 64, 16>}, {transform_indices = @transform_1, window_bounds = array<i64: 1, 16, 64>}, {pipeline_mode = #tpu.pipeline_mode<synchronous>, transform_indices = @transform_2, window_bounds = array<i64: 16, 48>}, {pipeline_mode = #tpu.pipeline_mode<synchronous>, transform_indices = @transform_3, window_bounds = array<i64: 1, 48>}, {pipeline_mode = #tpu.pipeline_mode<synchronous>, transform_indices = @transform_4, window_bounds = array<i64: 48, 16>}, {pipeline_mode = #tpu.pipeline_mode<synchronous>, transform_indices = @transform_5, window_bounds = array<i64: 48, 1>}, {pipeline_mode = #tpu.pipeline_mode<synchronous>, transform_indices = @transform_6, window_bounds = array<i64: 17, 16>}, {pipeline_mode = #tpu.pipeline_mode<synchronous>, transform_indices = @transform_7, window_bounds = array<i64: 17, 1>}, {transform_indices = @transform_8, window_bounds = array<i64: 1, 16, 64>}]} {
    %c0 = arith.constant 0 : index
    %c0_0 = arith.constant 0 : index
    %c0_1 = arith.constant 0 : index
    %0 = vector.load %arg2[%c0, %c0_0, %c0_1] : memref<1x64x16xf32, #tpu.memory_space<vmem>>, vector<1x64x16xf32>
    %1 = vector.shape_cast %0 : vector<1x64x16xf32> to vector<64x16xf32>
    %c0_2 = arith.constant 0 : index
    %c0_3 = arith.constant 0 : index
    %c0_4 = arith.constant 0 : index
    %2 = vector.load %arg3[%c0_2, %c0_3, %c0_4] : memref<1x16x64xf32, #tpu.memory_space<vmem>>, vector<1x16x64xf32>
    %3 = vector.shape_cast %2 : vector<1x16x64xf32> to vector<16x64xf32>
    %c0_5 = arith.constant 0 : index
    %c0_6 = arith.constant 0 : index
    %4 = vector.load %arg4[%c0_5, %c0_6] : memref<16x48xf32, #tpu.memory_space<vmem>>, vector<16x48xf32>
    %cst = arith.constant dense<0.000000e+00> : vector<64x48xf32>
    %5 = tpu.matmul %1, %4, %cst {dimension_numbers = #tpu.dot_dimension_numbers<[1], [0], [0], [1], [0, 0, 1, 1], [], []>} : vector<64x16xf32>, vector<16x48xf32>, vector<64x48xf32> -> vector<64x48xf32>
    %c0_7 = arith.constant 0 : index
    %c0_8 = arith.constant 0 : index
    %6 = vector.load %arg5[%c0_7, %c0_8] : memref<1x48xf32, #tpu.memory_space<vmem>>, vector<1x48xf32>
    %7 = vector.broadcast %6 : vector<1x48xf32> to vector<64x48xf32>
    %8 = arith.addf %5, %7 : vector<64x48xf32>
    %c0_9 = arith.constant 0 : index
    %c0_10 = arith.constant 0 : index
    %9 = vector.load %arg6[%c0_9, %c0_10] : memref<48x16xf32, #tpu.memory_space<vmem>>, vector<48x16xf32>
    %cst_11 = arith.constant dense<0.000000e+00> : vector<48x64xf32>
    %10 = tpu.matmul %9, %3, %cst_11 {dimension_numbers = #tpu.dot_dimension_numbers<[1], [0], [0], [1], [0, 0, 1, 1], [], []>} : vector<48x16xf32>, vector<16x64xf32>, vector<48x64xf32> -> vector<48x64xf32>
    %c0_12 = arith.constant 0 : index
    %c0_13 = arith.constant 0 : index
    %11 = vector.load %arg7[%c0_12, %c0_13] : memref<48x1xf32, #tpu.memory_space<vmem>>, vector<48x1xf32>
    %12 = vector.broadcast %11 : vector<48x1xf32> to vector<48x64xf32>
    %13 = arith.addf %10, %12 : vector<48x64xf32>
    %c0_14 = arith.constant 0 : index
    %c0_15 = arith.constant 0 : index
    %14 = vector.load %arg8[%c0_14, %c0_15] : memref<17x16xf32, #tpu.memory_space<vmem>>, vector<17x16xf32>
    %cst_16 = arith.constant dense<0.000000e+00> : vector<17x64xf32>
    %15 = tpu.matmul %14, %3, %cst_16 {dimension_numbers = #tpu.dot_dimension_numbers<[1], [0], [0], [1], [0, 0, 1, 1], [], []>} : vector<17x16xf32>, vector<16x64xf32>, vector<17x64xf32> -> vector<17x64xf32>
    %c0_17 = arith.constant 0 : index
    %c0_18 = arith.constant 0 : index
    %16 = vector.load %arg9[%c0_17, %c0_18] : memref<17x1xf32, #tpu.memory_space<vmem>>, vector<17x1xf32>
    %17 = vector.broadcast %16 : vector<17x1xf32> to vector<17x64xf32>
    %18 = arith.addf %15, %17 : vector<17x64xf32>
    %19 = arith.truncf %8 : vector<64x48xf32> to vector<64x48xbf16>
    %20 = arith.truncf %13 : vector<48x64xf32> to vector<48x64xbf16>
    %cst_19 = arith.constant dense<0.000000e+00> : vector<64x64xf32>
    %21 = tpu.matmul %19, %20, %cst_19 {dimension_numbers = #tpu.dot_dimension_numbers<[1], [0], [0], [1], [0, 0, 1, 1], [], []>} : vector<64x48xbf16>, vector<48x64xbf16>, vector<64x64xf32> -> vector<64x64xf32>
    %cst_20 = arith.constant dense<0xFF800000> : vector<64xf32>
    %22 = vector.multi_reduction <maximumf>, %21, %cst_20 [1] : vector<64x64xf32> to vector<64xf32>
    %23 = vector.shape_cast %22 : vector<64xf32> to vector<64x1xf32>
    %24 = vector.broadcast %23 : vector<64x1xf32> to vector<64x64xf32>
    %25 = arith.subf %21, %24 : vector<64x64xf32>
    %26 = math.exp %25 : vector<64x64xf32>
    %27 = arith.truncf %18 : vector<17x64xf32> to vector<17x64xbf16>
    %28 = arith.truncf %26 : vector<64x64xf32> to vector<64x64xbf16>
    %cst_21 = arith.constant dense<0.000000e+00> : vector<17x64xf32>
    %29 = tpu.matmul %27, %28, %cst_21 {dimension_numbers = #tpu.dot_dimension_numbers<[1], [1], [0], [0], [0, 0, 1, 0], [], []>} : vector<17x64xbf16>, vector<64x64xbf16>, vector<17x64xf32> -> vector<17x64xf32>
    %30 = vector.extract_strided_slice %29 {offsets = [16, 0], sizes = [1, 64], strides = [1, 1]} : vector<17x64xf32> to vector<1x64xf32>
    %31 = vector.extract_strided_slice %29 {offsets = [0, 0], sizes = [16, 64], strides = [1, 1]} : vector<17x64xf32> to vector<16x64xf32>
    %32 = tpu.reciprocal %30 {approx = true} : vector<1x64xf32> -> vector<1x64xf32>
    %33 = vector.broadcast %32 : vector<1x64xf32> to vector<16x64xf32>
    %34 = arith.mulf %31, %33 : vector<16x64xf32>
    %c0_22 = arith.constant 0 : index
    %c0_23 = arith.constant 0 : index
    %c0_24 = arith.constant 0 : index
    %35 = vector.load %arg10[%c0_22, %c0_23, %c0_24] : memref<1x16x64xf32, #tpu.memory_space<vmem>>, vector<1x16x64xf32>
    %36 = vector.shape_cast %35 : vector<1x16x64xf32> to vector<16x64xf32>
    %37 = vector.shape_cast %34 : vector<16x64xf32> to vector<1x16x64xf32>
    tpu.vector_store %arg10[%c0_22, %c0_23, %c0_24], %37 {strides = array<i32>} : memref<1x16x64xf32, #tpu.memory_space<vmem>>, vector<1x16x64xf32>,
    return
  }
  func.func @transform_0(%arg0: i32, %arg1: i32) -> (i32, i32, i32) {
    %c0_i32 = arith.constant 0 : i32
    %c0_i32_0 = arith.constant 0 : i32
    return %arg0, %arg1, %c0_i32 : i32, i32, i32
  }
  func.func @transform_1(%arg0: i32, %arg1: i32) -> (i32, i32, i32) {
    %c0_i32 = arith.constant 0 : i32
    %c0_i32_0 = arith.constant 0 : i32
    %c0_i32_1 = arith.constant 0 : i32
    return %arg0, %c0_i32, %c0_i32_0 : i32, i32, i32
  }
  func.func @transform_2(%arg0: i32, %arg1: i32) -> (i32, i32) {
    %c0_i32 = arith.constant 0 : i32
    %c0_i32_0 = arith.constant 0 : i32
    %c0_i32_1 = arith.constant 0 : i32
    return %c0_i32, %c0_i32_0 : i32, i32
  }
  func.func @transform_3(%arg0: i32, %arg1: i32) -> (i32, i32) {
    %c0_i32 = arith.constant 0 : i32
    %c0_i32_0 = arith.constant 0 : i32
    %c0_i32_1 = arith.constant 0 : i32
    return %c0_i32, %c0_i32_0 : i32, i32
  }
  func.func @transform_4(%arg0: i32, %arg1: i32) -> (i32, i32) {
    %c0_i32 = arith.constant 0 : i32
    %c0_i32_0 = arith.constant 0 : i32
    %c0_i32_1 = arith.constant 0 : i32
    return %c0_i32, %c0_i32_0 : i32, i32
  }
  func.func @transform_5(%arg0: i32, %arg1: i32) -> (i32, i32) {
    %c0_i32 = arith.constant 0 : i32
    %c0_i32_0 = arith.constant 0 : i32
    %c0_i32_1 = arith.constant 0 : i32
    return %c0_i32, %c0_i32_0 : i32, i32
  }
  func.func @transform_6(%arg0: i32, %arg1: i32) -> (i32, i32) {
    %c0_i32 = arith.constant 0 : i32
    %c0_i32_0 = arith.constant 0 : i32
    %c0_i32_1 = arith.constant 0 : i32
    return %c0_i32, %c0_i32_0 : i32, i32
  }
  func.func @transform_7(%arg0: i32, %arg1: i32) -> (i32, i32) {
    %c0_i32 = arith.constant 0 : i32
    %c0_i32_0 = arith.constant 0 : i32
    %c0_i32_1 = arith.constant 0 : i32
    return %c0_i32, %c0_i32_0 : i32, i32
  }
  func.func @transform_8(%arg0: i32, %arg1: i32) -> (i32, i32, i32) {
    %c0_i32 = arith.constant 0 : i32
    %c0_i32_0 = arith.constant 0 : i32
    return %arg0, %c0_i32, %arg1 : i32, i32, i32
  }
}

</mosaic_0001>

<bundles_post_ra>
// kernel: dgm_forward.1
= control target key start
LH: loop header
LB: loop body
LE: loop exit
PB: predicated region body
PF: predicated region fallthrough
CT: control target
= control target key end

     0   :  { %s1354_s27 = smov 0   ;;  %s1356_s28 = smov 0   ;;  %s1513_s0 = inlined_call_operand.vmem [shape: f32[2,64,16], index: 0, kind: input, shape index: {}]   ;;  %s1514_s1 = inlined_call_operand.vmem [shape: f32[2,16,64], index: 1, kind: input, shape index: {}]   ;;  %s1515_s2 = inlined_call_operand.vmem [shape: f32[16,48], index: 2, kind: input, shape index: {}]   ;;  %s1516_s3 = inlined_call_operand.vmem [shape: f32[1,48], index: 3, kind: input, shape index: {}]   ;;  %s1517_s4 = inlined_call_operand.vmem [shape: f32[48,16], index: 4, kind: input, shape index: {}]   ;;  %s1518_s5 = inlined_call_operand.vmem [shape: f32[48,1], index: 5, kind: input, shape index: {}]   ;;  %s1519_s6 = inlined_call_operand.vmem [shape: f32[17,16], index: 6, kind: input, shape index: {}]   ;;  %s1520_s7 = inlined_call_operand.vmem [shape: f32[17,1], index: 7, kind: input, shape index: {}]   ;;  %s1521_s8 = inlined_call_operand.vmem [shape: f32[2,16,64], index: 8, kind: output, shape index: {}]  }
   0x1   :  { %s1358_s29 = smov 0  }
   0x2 LB: > { %s30_s30 = sadd.s32 1, %s1300_s28  ;;  %p1091_p0 = scmp.ge.s32.totalorder %s1304_s29, 1  ;;  %s1304_s29 = sphi %s1358_s29, %s18_s29   ;;  %s1300_s28 = sphi %s1356_s28, %s1523_s28   ;;  %s1296_s27 = sphi %s1354_s27, %s1522_s27  }
   0x3   : > { %p32_p1 = scmp.ge.s32.totalorder %s30_s30, 2  ;;  %p293_p2 = scmp.lt.s32.totalorder %s1304_s29, 3 }
   0x5   : > { %s1525_s30 = smov (%p32_p1, %s30_s30), 0  ;;  %p294_p3 = pnand %p1091_p0, %p293_p2 }
   0x6   : > { %p340_p4 = scmp.lt.s32.totalorder (!%p294_p3), %s1296_s27, 1 }
   0x7   : > { %297 = sbr.rel (%p294_p3) target bundleno = 861 (0x35d), region = 52 }
   0xc   : > { %v374_v0 = vld [vmem:[%s1515_s2 + $0x8] sm:$0xff]  ;;  %v373_v1 = vld [vmem:[%s1515_s2] sm:$0xff]  ;;  %v1306_v2 = vmov 0   ;;  %s1527_s27 = smov (!%p340_p4, %s1296_s27), 1  ;;  %v520_v3 = vld [vmem:[%s1518_s5 + $0x10] sm:$0xff]  ;;  %vm382_vm0 = vcmask 130048  }
   0xd   : > { %1163 = vmatprep.subr.mxu0 %v374_v0  ;;  %1263 = vset.pattern.permute.xlu1 %v1306_v2  ;;  %v522_v4 = vld [vmem:[%s1518_s5 + $0x20] sm:$0xff]  ;;  %s1124_s17 = sshll.u32 %s1527_s27, 6  ;;  %s1125_s18 = sshll.u32 %s1527_s27, 4  ;;  %v521_v5 = vld [vmem:[%s1518_s5 + $0x18] sm:$0xff]  ;;  %v523_v10 = vld [vmem:[%s1518_s5 + $0x28] sm:$0xff]  ;;  %v1307_v25 = vmov 0.0  }
   0xe   : > { %1164 = vmatpush3.msra.mxu0 %v374_v0  ;;  %1262 = vset.pattern.permute.xlu0 %v1306_v2  ;;  %s347_s21 = scalar_lea.vmem %s1513_s0, %s1124_s17  ;;  %s353_s24 = scalar_lea.vmem %s1514_s1, %s1125_s18  ;;  %v519_v13 = vld [vmem:[%s1518_s5 + $0x8] sm:$0xff]  ;;  %v518_v15 = vld [vmem:[%s1518_s5] sm:$0xff]  ;;  %v514_v21 = vld [vmem:[%s1517_s4 + $0x10] sm:$0xff]  ;;  %vm1308_vm1 = vmmov 0   ;;  %vm784_vm2 = vcmask 392192   ;;  %vm862_vm3 = vcmask 523264  }
   0xf   : > { %1165 = vmatprep.subr.mxu0 %v373_v1  ;;  %536 = vperm.xlu1 %1263, %v520_v3   ;;  %v363_v6 = vld [vmem:[%s347_s21] sm:$0xff]  ;;  %v364_v7 = vld [vmem:[%s347_s21 + $0x8] sm:$0xff]  ;;  %v365_v9 = vld [vmem:[%s347_s21 + $0x10] sm:$0xff]  ;;  %s361_s9 = scalar_lea.vmem %s1521_s8, %s1125_s18 }
  0x10   : > { %1166 = vmatpush3.msra.mxu0 %v373_v1  ;;  %546 = vperm.xlu0 %1262, %v522_v4   ;;  %v372_v8 = vld [vmem:[%s353_s24 + $0x8] sm:$0xff]  ;;  %v371_v11 = vld [vmem:[%s353_s24] sm:$0xff]  ;;  %v366_v12 = vld [vmem:[%s347_s21 + $0x18] sm:$0xff] }
  0x11   : > { %1167 = vmatprep.mubr.msk.f32.mxu0 %vm382_vm0, %v363_v6  ;;  %1179 = vmatprep.subr.mxu0 %v372_v8  ;;  %v367_v14 = vld [vmem:[%s347_s21 + $0x20] sm:$0xff]  ;;  %v368_v16 = vld [vmem:[%s347_s21 + $0x28] sm:$0xff]  ;;  %v369_v17 = vld [vmem:[%s347_s21 + $0x30] sm:$0xff] }
  0x12   : > { %1168 = vmatmul.mubr.msk.f32.vlgmr.msra.gmra.mxu0 %vm382_vm0, %v364_v7  ;;  %v370_v18 = vld [vmem:[%s347_s21 + $0x38] sm:$0xff]  ;;  %v512_v19 = vld [vmem:[%s1517_s4] sm:$0xff]  ;;  %v513_v20 = vld [vmem:[%s1517_s4 + $0x8] sm:$0xff]  ;;  %1192 = vmatprep.subr.mxu1 %v1307_v25 }
  0x13   : > { %541 = vperm.xlu1 %1263, %v521_v5   ;;  %1180 = vmatpush3.msra.mxu0 %v372_v8  ;;  %v515_v22 = vld [vmem:[%s1517_s4 + $0x18] sm:$0xff]  ;;  %v516_v23 = vld [vmem:[%s1517_s4 + $0x20] sm:$0xff]  ;;  %v517_v24 = vld [vmem:[%s1517_s4 + $0x28] sm:$0xff] }
  0x14   : > { %1170 = vmatprep.mubr.msk.f32.mxu0 %vm382_vm0, %v365_v9  ;;  %1181 = vmatprep.subr.mxu0 %v371_v11  ;;  %v667_v26 = vld [vmem:[%s1519_s6] sm:$0xff]  ;;  %v668_v27 = vld [vmem:[%s1519_s6 + $0x8] sm:$0xff]  ;;  %v669_v28 = vld [vmem:[%s1519_s6 + $0x10] sm:$0x1] }
  0x15   : > { %551 = vperm.xlu0 %1262, %v523_v10   ;;  %1182 = vmatpush3.msra.mxu0 %v371_v11  ;;  %v1098_v30 = vld [vmem:[%s1516_s3] ss:$0 sm:$0xff] }
  0x16   : > { %1171 = vmatmul.mubr.msk.f32.gmra.mxu0 %vm382_vm0, %v366_v12  ;;  %1196 = vmatprep.mubr.msk.f32.mxu1 %vm1308_vm1, %v1307_v25 }
  0x17   : > { %531 = vperm.xlu1 %1263, %v519_v13   ;;  %1173 = vmatprep.mubr.msk.f32.mxu0 %vm382_vm0, %v367_v14 }
  0x18   : > { %1193 = vmatpush3.msra.mxu1 %v372_v8 }
  0x19   : > { %526 = vperm.xlu0 %1262, %v518_v15   ;;  %1194 = vmatprep.subr.mxu1 %v1307_v25 }
  0x1a   : > { %1174 = vmatmul.mubr.msk.f32.gmra.mxu0 %vm382_vm0, %v368_v16  ;;  %1195 = vmatpush3.msra.mxu1 %v371_v11 }
  0x1b   : > { %1176 = vmatprep.mubr.msk.f32.mxu0 %vm382_vm0, %v369_v17  ;;  %1197 = vmatmul.mubr.msk.f32.vlgmr.msra.gmra.mxu1 %vm382_vm0, %v667_v26 }
  0x1c   : > { %1199 = vmatprep.mubr.msk.f32.mxu1 %vm1308_vm1, %v1307_v25 }
  0x1e   : > { %1177 = vmatmul.mubr.msk.f32.gmra.mxu0 %vm382_vm0, %v370_v18 }
  0x1f   : > { %1183 = vmatprep.mubr.msk.f32.mxu0 %vm382_vm0, %v512_v19  ;;  %1200 = vmatmul.mubr.msk.f32.gmra.mxu1 %vm382_vm0, %v668_v27 }
  0x20   : > { %1202 = vmatprep.mubr.msk.f32.mxu1 %vm1308_vm1, %v1307_v25  ;;  %v670_v25 = vld [vmem:[%s1520_s7] sm:$0xff] }
  0x22   : > { %1184 = vmatmul.mubr.msk.f32.vlgmr.msra.gmra.mxu0 %vm382_vm0, %v513_v20 }
  0x23   : > { %1186 = vmatprep.mubr.msk.f32.mxu0 %vm382_vm0, %v514_v21  ;;  %1203 = vmatmul.mubr.msk.f32.gmra.mxu1 %vm382_vm0, %v669_v28  ;;  %v672_v28 = vld [vmem:[%s1520_s7 + $0x10] sm:$0x1] }
  0x26   : > { %1187 = vmatmul.mubr.msk.f32.gmra.mxu0 %vm382_vm0, %v515_v22 }
  0x27   : > { %1189 = vmatprep.mubr.msk.f32.mxu0 %vm382_vm0, %v516_v23 }
  0x2a   : > { %1190 = vmatmul.mubr.msk.f32.gmra.mxu0 %vm382_vm0, %v517_v24 }
  0x8a   : > { %v537_v43 = vpop.permute.xlu1 %536 }
  0x8b   : > { %v547_v41 = vpop.permute.xlu0 %546 }
  0x8e   : > { %v542_v48 = vpop.permute.xlu1 %541 }
  0x90   : > { %v552_v46 = vpop.permute.xlu0 %551 }
  0x92   : > { %v532_v57 = vpop.permute.xlu1 %531 }
  0x94   : > { %v527_v54 = vpop.permute.xlu0 %526 }
  0xd2   : > { %v1169_v29 = vpop.f32.mrf.mxu0 }
  0xd3   : > { %v479_v32 = vadd.f32 %v1169_v29, %v1098_v30 }
  0xd4   : > { %v473_v31 = vpop.f32.mrf.mxu0 }
  0xd5   : > { %v474_v33 = vadd.f32 %v1098_v30, %v473_v31  ;;  %v671_v31 = vld [vmem:[%s1520_s7 + $0x8] sm:$0xff] }
  0xd6   : > { %v1172_v34 = vpop.f32.mrf.mxu0 }
  0xd7   : > { %v777_v35 = vpack.c.bf16 %v479_v32, %v474_v33  ;;  %v489_v0 = vadd.f32 %v1172_v34, %v1098_v30 }
  0xd8   : > { %v483_v36 = vpop.f32.mrf.mxu0 }
  0xd9   : > { %1211 = vmatprep.mubr.msk.bf16.mxu0 %vm784_vm2, %v777_v35  ;;  %v484_v62 = vadd.f32 %v1098_v30, %v483_v36 }
  0xda   : > { %v1175_v37 = vpop.f32.mrf.mxu0 }
  0xdb   : > { %v499_v1 = vadd.f32 %v1175_v37, %v1098_v30  ;;  %v778_v2 = vpack.c.bf16 %v489_v0, %v484_v62  ;;  %v763_v23 = vpop.f32.mrf.mxu1 }
  0xdc   : > { %v493_v38 = vpop.f32.mrf.mxu0 }
  0xdd   : > { %v494_v63 = vadd.f32 %v1098_v30, %v493_v38  ;;  %v1198_v24 = vpop.f32.mrf.mxu1 }
  0xde   : > { %v1178_v39 = vpop.f32.mrf.mxu0 }
  0xdf   : > { %v779_v3 = vpack.c.bf16 %v499_v1, %v494_v63  ;;  %v509_v5 = vadd.f32 %v1178_v39, %v1098_v30  ;;  %v768_v26 = vpop.f32.mrf.mxu1 }
  0xe0   : > { %v503_v40 = vpop.f32.mrf.mxu0 }
  0xe1   : > { %v504_v4 = vadd.f32 %v1098_v30, %v503_v40  ;;  %v1201_v27 = vpop.f32.mrf.mxu1 }
  0xe2   : > { %v1185_v42 = vpop.f32.mrf.mxu0 }
  0xe3   : > { %v644_v60 = vadd.f32 %v1185_v42, %v532_v57  ;;  %v780_v6 = vpack.c.bf16 %v509_v5, %v504_v4  ;;  %v1479_v29 = vpop.f32.mrf.mxu1 }
  0xe4   : > { %v638_v44 = vpop.f32.mrf.mxu0 }
  0xe5   : > { %v639_v58 = vadd.f32 %v638_v44, %v527_v54  ;;  %v1204_v30 = vpop.f32.mrf.mxu1 }
  0xe6   : > { %v1188_v45 = vpop.f32.mrf.mxu0 }
  0xe7   : > { %v654_v55 = vadd.f32 %v1188_v45, %v542_v48  ;;  %v781_v61 = vpack.c.bf16 %v644_v60, %v639_v58 }
  0xe8   : > { %v648_v47 = vpop.f32.mrf.mxu0 }
  0xe9   : > { %v649_v51 = vadd.f32 %v648_v47, %v537_v43 }
  0xea   : > { %v1191_v49 = vpop.f32.mrf.mxu0 }
  0xeb   : > { %v664_v52 = vadd.f32 %v1191_v49, %v552_v46  ;;  %v782_v59 = vpack.c.bf16 %v654_v55, %v649_v51 }
  0xec   : > { %v658_v50 = vpop.f32.mrf.mxu0 }
  0xed   : > { %v659_v53 = vadd.f32 %v658_v50, %v547_v41 }
  0xef   : > { %v783_v56 = vpack.c.bf16 %v664_v52, %v659_v53 }
  0xf1   : > { %1205 = vmatprep.subr.bf16.mxu0 %v783_v56 }
  0xf2   : > { %1206 = vmatpush3.bf16.msra.mxu0 %v783_v56 }
  0xf3   : > { %1207 = vmatprep.subr.bf16.mxu0 %v782_v59 }
  0xf6   : > { %1208 = vmatpush3.bf16.msra.mxu0 %v782_v59 }
  0xf7   : > { %1209 = vmatprep.subr.bf16.mxu0 %v781_v61 }
  0xfa   : > { %1210 = vmatpush3.bf16.msra.mxu0 %v781_v61 }
  0xfd   : > { %1212 = vmatmul.mubr.msk.bf16.vlgmr.msra.gmra.mxu0 %vm784_vm2, %v778_v2 }
  0xfe   : > { %1215 = vmatprep.mubr.msk.bf16.mxu0 %vm784_vm2, %v779_v3 }
 0x105   : > { %1216 = vmatmul.mubr.msk.bf16.gmra.mxu0 %vm784_vm2, %v780_v6 }
 0x1bd   : > { %v1213_v7 = vpop.f32.mrf.mxu0 }
 0x1be   : > { %v869_v18 = vsel %vm862_vm3, %v1213_v7, -inf }
 0x1bf   : > { %v1459_v8 = vpop.f32.mrf.mxu0 }
 0x1c0   : > { %v863_v20 = vsel %vm862_vm3, %v1459_v8, -inf }
 0x1c1   : > { %v1214_v9 = vpop.f32.mrf.mxu0 }
 0x1c2   : > { %v872_v21 = vsel %vm862_vm3, %v1214_v9, -inf }
 0x1c3   : > { %v1461_v10 = vpop.f32.mrf.mxu0 }
 0x1c4   : > { %v866_v22 = vsel %vm862_vm3, %v1461_v10, -inf }
 0x1c5   : > { %v1217_v11 = vpop.f32.mrf.mxu0 }
 0x1c6   : > { %v881_v12 = vsel %vm862_vm3, %v1217_v11, -inf }
 0x1c7   : > { %882 = vmax.xlane.f32.xlu0 %v881_v12  ;;  %v847_v13 = vpop.f32.mrf.mxu0 }
 0x1c8   : > { %v875_v15 = vsel %vm862_vm3, %v847_v13, -inf }
 0x1c9   : > { %v1218_v14 = vpop.f32.mrf.mxu0 }
 0x1ca   : > { %v884_v16 = vsel %vm862_vm3, %v1218_v14, -inf }
 0x1cb   : > { %876 = vmax.xlane.f32.xlu0 %v875_v15  ;;  %885 = vmax.xlane.f32.xlu1 %v884_v16  ;;  %v850_v17 = vpop.f32.mrf.mxu0 }
 0x1cc   : > { %v878_v19 = vsel %vm862_vm3, %v850_v17, -inf }
 0x1cf   : > { %870 = vmax.xlane.f32.xlu1 %v869_v18  ;;  %879 = vmax.xlane.f32.xlu0 %v878_v19  ;;  %v984_v18 = vlaneseq }
 0x1d3   : > { %864 = vmax.xlane.f32.xlu1 %v863_v20  ;;  %873 = vmax.xlane.f32.xlu0 %v872_v21  ;;  %v985_v20 = vshrl.u32 %v984_v18, 7 }
 0x1d5   : > { %v986_v21 = vsub.s32 0, %v985_v20 }
 0x1d7   : > { %867 = vmax.xlane.f32.xlu0 %v866_v22 }
 0x1e4   : > { %675 = vperm.xlu1 %1263, %v670_v25  }
 0x1e8   : > { %685 = vperm.xlu1 %1263, %v672_v28  }
 0x1ed   : > { %680 = vperm.xlu0 %1262, %v671_v31  }
 0x250   : > { %v883_v32 = vpop.xlane.xlu0 %882 }
 0x251   : > { %v893_v33 = vsub.f32 %v1217_v11, %v883_v32 }
 0x253   : > { %v907_v36 = vmul.f32 1.442695, %v893_v33 }
 0x254   : > { %v877_v34 = vpop.xlane.xlu0 %876  ;;  %v886_v35 = vpop.xlane.xlu1 %885 }
 0x255   : > { %v891_v37 = vsub.f32 %v847_v13, %v877_v34  ;;  %v894_v38 = vsub.f32 %v1218_v14, %v886_v35  ;;  %1264 = vpow2.f32 %v907_v36 }
 0x257   : > { %v909_v39 = vmul.f32 1.442695, %v894_v38  ;;  %v903_v41 = vmul.f32 1.442695, %v891_v37 }
 0x258   : > { %v880_v40 = vpop.xlane.xlu0 %879  ;;  %v871_v42 = vpop.xlane.xlu1 %870 }
 0x259   : > { %v892_v43 = vsub.f32 %v850_v17, %v880_v40  ;;  %1266 = vpow2.f32 %v909_v39  ;;  %v889_v45 = vsub.f32 %v1213_v7, %v871_v42 }
 0x25a   : > { %1268 = vpow2.f32 %v903_v41 }
 0x25b   : > { %v905_v44 = vmul.f32 1.442695, %v892_v43  ;;  %v899_v49 = vmul.f32 1.442695, %v889_v45 }
 0x25c   : > { %v874_v46 = vpop.xlane.xlu0 %873  ;;  %v865_v50 = vpop.xlane.xlu1 %864 }
 0x25d   : > { %v890_v47 = vsub.f32 %v1214_v9, %v874_v46  ;;  %1270 = vpow2.f32 %v905_v44  ;;  %v887_v53 = vsub.f32 %v1459_v8, %v865_v50 }
 0x25f   : > { %v901_v48 = vmul.f32 1.442695, %v890_v47  ;;  %v895_v58 = vmul.f32 1.442695, %v887_v53 }
 0x260   : > { %v868_v51 = vpop.xlane.xlu0 %867  ;;  %v676_v55 = vpop.permute.xlu1 %675 }
 0x261   : > { %1272 = vpow2.f32 %v901_v48  ;;  %v888_v52 = vsub.f32 %v1461_v10, %v868_v51  ;;  %v764_v61 = vadd.f32 %v763_v23, %v676_v55 }
 0x262   : > { %1274 = vpow2.f32 %v899_v49  ;;  %v1265_v54 = vpop.eup %1264 }
 0x263   : > { %v897_v56 = vmul.f32 1.442695, %v888_v52 }
 0x264   : > { %v686_v12 = vpop.permute.xlu1 %685 }
 0x265   : > { %1276 = vpow2.f32 %v897_v56  ;;  %v774_v14 = vadd.f32 %v1479_v29, %v686_v12 }
 0x266   : > { %v1267_v57 = vpop.eup %1266  ;;  %1278 = vpow2.f32 %v895_v58 }
 0x267   : > { %v916_v60 = vpack.c.bf16 %v1267_v57, %v1265_v54  ;;  %v1269_v63 = vpop.eup %1268  ;;  %v912_v15 = vpack.c.bf16 %v774_v14, %v774_v14 }
 0x268   : > { %v681_v59 = vpop.permute.xlu0 %680 }
 0x269   : > { %v769_v62 = vadd.f32 %v768_v26, %v681_v59  ;;  %1231 = vmatprep.subr.msk.bf16.mxu1 %vm862_vm3, %v916_v60  ;;  %v933_v0 = vsel %vm862_vm3, %v916_v60, 0 }
 0x26a   : > { %v1271_v1 = vpop.eup %1270  ;;  %1220 = vmatpush3.bf16.xpose.msra.mxu1 %v933_v0 }
 0x26b   : > { %v911_v2 = vpack.c.bf16 %v769_v62, %v764_v61  ;;  %v915_v3 = vpack.c.bf16 %v1271_v1, %v1269_v63 }
 0x26d   : > { %1227 = vmatprep.mubr.msk.bf16.mxu1 %vm862_vm3, %v911_v2  ;;  %1232 = vmatprep.subr.msk.bf16.mxu1 %vm862_vm3, %v915_v3  ;;  %v930_v6 = vsel %vm862_vm3, %v915_v3, 0 }
 0x26e   : > { %v1273_v4 = vpop.eup %1272 }
 0x26f   : > { %v1275_v5 = vpop.eup %1274 }
 0x270   : > { %v914_v7 = vpack.c.bf16 %v1273_v4, %v1275_v5 }
 0x272   : > { %1222 = vmatpush3.bf16.xpose.msra.mxu1 %v930_v6  ;;  %v1277_v8 = vpop.eup %1276  ;;  %v927_v10 = vsel %vm862_vm3, %v914_v7, 0 }
 0x273   : > { %1233 = vmatprep.subr.msk.bf16.mxu1 %vm862_vm3, %v914_v7  ;;  %v1279_v9 = vpop.eup %1278 }
 0x274   : > { %v913_v11 = vpack.c.bf16 %v1277_v8, %v1279_v9 }
 0x276   : > { %v924_v13 = vsel %vm862_vm3, %v913_v11, 0 }
 0x27a   : > { %1224 = vmatpush3.bf16.xpose.msra.mxu1 %v927_v10 }
 0x27b   : > { %1234 = vmatprep.subr.msk.bf16.mxu1 %vm862_vm3, %v913_v11 }
 0x282   : > { %1226 = vmatpush3.bf16.xpose.msra.mxu1 %v924_v13 }
 0x289   : > { %1228 = vmatmul.mubr.msk.bf16.vlgmr.msra.gmra.mxu1 %vm862_vm3, %v912_v15 }
 0x349   : > { %v1229_v16 = vpop.f32.mrf.mxu1 }
 0x34a   : > { %1280 = vrcp.f32 %v1229_v16 }
 0x34b   : > { %v969_v17 = vpop.f32.mrf.mxu1 }
 0x34d   : > { %v1230_v19 = vpop.f32.mrf.mxu1 }
 0x34f   : > { %v972_v24 = vpop.f32.mrf.mxu1 }
 0x357   : > { %v1281_v22 = vpop.eup %1280 }
 0x358   : > { %v987_v23 = vrot.slane %v1281_v22, %v986_v21 }
 0x35a   : > { %v988_v25 = vmul.f32 %v987_v23, %v969_v17  ;;  %v989_v26 = vmul.f32 %v987_v23, %v972_v24 }
 0x35c   : > { %990 = vst.msk [vmem:[%s361_s9] sm:$0xff] %vm862_vm3, %v988_v25  ;;  %991 = vst.msk [vmem:[%s361_s9 + $0x8] sm:$0xff] %vm862_vm3, %v989_v26 }
 0x35d PF: > { %s18_s29 = sadd.s32 1, %s1304_s29   ;;  %s1522_s27 = smov %s1300_s28 }
 0x35e   : > { %p15_p5 = scmp.ge.s32.totalorder %s18_s29, 4   ;;  %s1523_s28 = smov %s1525_s30 }
 0x360   :  { %17 = sbr.rel (!%p15_p5) target bundleno = 2 (0x2), region = 85 }

</bundles_post_ra>
